<compile_context>
chip_gen: v5e
topology: v5e:2x2
jax: 0.10.0
libtpu: 0.0.40
codegen_flags: <defaults>
</compile_context>

<pallas_src>
import functools

import jax
import jax.numpy as jnp
from jax.experimental import pallas as pl
from jax.experimental.pallas import tpu as pltpu


def _a2c_kernel(x_ref, w1_ref, b1_ref, wh_ref, bh_ref,
                mu_ref, var_ref, val_ref, *, action_size):
    # Base: Linear + ReLU (MXU matmul, f32 accumulate).
    h = jnp.dot(x_ref[...], w1_ref[...], preferred_element_type=jnp.float32) + b1_ref[...]
    h = jnp.maximum(h, 0.0)

    # Fused heads: one narrow [TILE_B, 2A+1] MXU matmul.
    #   columns [0, A) -> mu head, [A, 2A) -> var head, [2A] -> value head
    y = jnp.dot(h, wh_ref[...], preferred_element_type=jnp.float32) + bh_ref[...]

    a = action_size
    y_mu = y[:, 0:a]
    y_var = y[:, a:2 * a]

    mu_ref[...] = jnp.tanh(y_mu)                                   # EUP
    # Lean, numerically stable softplus: max(y,0) + log1p(exp(-|y|)).
    var_ref[...] = jnp.maximum(y_var, 0.0) + jnp.log1p(jnp.exp(-jnp.abs(y_var)))
    val_ref[...] = y[:, 2 * a:2 * a + 1]


def pack_params(params, action_size, hidden_size):
    """Pack the 8 PyTorch-style params into 4 kernel arrays (fewer, denser DMAs)."""
    del action_size, hidden_size  # shapes are implied by the concatenation
    wh = jnp.concatenate([params["w_mu"], params["w_var"], params["w_val"]], axis=1)  # [H, 2A+1]
    bh = jnp.concatenate([params["b_mu"], params["b_var"], params["b_val"]], axis=1)  # [1, 2A+1]
    return dict(w1=params["w1"], b1=params["b1"], w_heads=wh, b_heads=bh)


def a2c_forward(x, packed, *, action_size, tile_b=1024, min_grid=2):
    """x: [B, state_size] f32.  packed: output of pack_params.

    Returns (mu [B, A], var [B, A], value [B, 1]) matching ModelA2C.forward.
    """
    w1, b1, wh, bh = packed["w1"], packed["b1"], packed["w_heads"], packed["b_heads"]
    B, S = x.shape
    H = w1.shape[1]
    A = action_size
    HW = wh.shape[1]                      # 2A + 1 packed head width

    # Batch tiling: at least `min_grid` grid steps (so v7x's 2nd TensorCore gets
    # work), each tile <= tile_b rows, balanced across tiles, rounded up to a
    # multiple of 8 sublanes.  Pad B to a whole number of tiles; padded rows are
    # sliced off below.
    n_tiles = max(min_grid, pl.cdiv(B, tile_b))
    tb = max(8, ((pl.cdiv(B, n_tiles) + 7) // 8) * 8)
    n_tiles = pl.cdiv(B, tb)
    b_pad = n_tiles * tb
    if b_pad != B:
        x = jnp.pad(x, ((0, b_pad - B), (0, 0)))

    kernel = functools.partial(_a2c_kernel, action_size=A)

    cost = pl.CostEstimate(
        flops=2 * b_pad * S * H + 2 * b_pad * H * HW,
        transcendentals=3 * b_pad * A,             # tanh + exp + log1p per action lane
        bytes_accessed=4 * (b_pad * S + S * H + H + H * HW + HW + b_pad * HW),
    )

    mu, var, value = pl.pallas_call(
        kernel,
        out_shape=(
            jax.ShapeDtypeStruct((b_pad, A), jnp.float32),
            jax.ShapeDtypeStruct((b_pad, A), jnp.float32),
            jax.ShapeDtypeStruct((b_pad, 1), jnp.float32),
        ),
        grid=(n_tiles,),
        in_specs=[
            pl.BlockSpec((tb, S), lambda i: (i, 0)),     # x: tiled over batch
            pl.BlockSpec((S, H), lambda i: (0, 0)),      # w1: VMEM-resident
            pl.BlockSpec((1, H), lambda i: (0, 0)),      # b1
            pl.BlockSpec((H, HW), lambda i: (0, 0)),     # fused head weights
            pl.BlockSpec((1, HW), lambda i: (0, 0)),     # fused head biases
        ],
        out_specs=(
            pl.BlockSpec((tb, A), lambda i: (i, 0)),     # mu  (block last-dim == full dim)
            pl.BlockSpec((tb, A), lambda i: (i, 0)),     # var
            pl.BlockSpec((tb, 1), lambda i: (i, 0)),     # value
        ),
        compiler_params=pltpu.CompilerParams(
            dimension_semantics=("parallel",),           # shard batch tiles across TCs (v7x)
            vmem_limit_bytes=32 * 1024 * 1024,
        ),
        cost_estimate=cost,
    )(x, w1, b1, wh, bh)

    if b_pad != B:
        mu, var, value = mu[:B], var[:B], value[:B]
    return mu, var, value


def init_params(key, state_size, action_size, hidden_size=32):
    """Deterministic synthetic parameters (PyTorch Linear-style uniform init)."""
    ks = jax.random.split(key, 8)

    def linear(kw, kb, fan_in, fan_out):
        bound = 1.0 / jnp.sqrt(fan_in)
        w = jax.random.uniform(kw, (fan_in, fan_out), jnp.float32, -bound, bound)
        b = jax.random.uniform(kb, (fan_out,), jnp.float32, -bound, bound)
        return w, b.reshape(1, fan_out)

    w1, b1 = linear(ks[0], ks[1], state_size, hidden_size)
    w_mu, b_mu = linear(ks[2], ks[3], hidden_size, action_size)
    w_var, b_var = linear(ks[4], ks[5], hidden_size, action_size)
    w_val, b_val = linear(ks[6], ks[7], hidden_size, 1)
    return dict(w1=w1, b1=b1, w_mu=w_mu, b_mu=b_mu,
                w_var=w_var, b_var=b_var, w_val=w_val, b_val=b_val)


def _reference(x, p):
    h = jnp.maximum(x @ p["w1"] + p["b1"], 0.0)
    mu = jnp.tanh(h @ p["w_mu"] + p["b_mu"])
    var = jax.nn.softplus(h @ p["w_var"] + p["b_var"])
    val = h @ p["w_val"] + p["b_val"]
    return mu, var, val


if __name__ == "__main__":
    # Small shapes consistent with the module: state=16, action=4, hidden=32, batch=8.
    B, STATE, ACTION, HIDDEN = 8, 16, 4, 32

    key = jax.random.PRNGKey(0)
    kx, kp = jax.random.split(key)
    params = init_params(kp, STATE, ACTION, HIDDEN)
    packed = pack_params(params, ACTION, HIDDEN)

    # Small batch (single grid step).
    x = jax.random.normal(kx, (B, STATE), dtype=jnp.float32)
    mu, var, value = jax.block_until_ready(a2c_forward(x, packed, action_size=ACTION))
    mu_r, var_r, val_r = _reference(x, params)
    assert mu.shape == (B, ACTION) and var.shape == (B, ACTION) and value.shape == (B, 1)
    assert jnp.allclose(mu, mu_r, atol=1e-5), "mu mismatch"
    assert jnp.allclose(var, var_r, atol=1e-5), "var mismatch"
    assert jnp.allclose(value, val_r, atol=1e-5), "value mismatch"

    # Ragged batch: exercises row padding and the multi-tile (>=2 step) grid.
    B2 = 50
    x2 = jax.random.normal(jax.random.PRNGKey(1), (B2, STATE), dtype=jnp.float32)
    mu2, var2, val2 = jax.block_until_ready(a2c_forward(x2, packed, action_size=ACTION))
    mu2_r, var2_r, val2_r = _reference(x2, params)
    assert mu2.shape == (B2, ACTION) and var2.shape == (B2, ACTION) and val2.shape == (B2, 1)
    assert jnp.allclose(mu2, mu2_r, atol=1e-5), "mu mismatch (padded batch)"
    assert jnp.allclose(var2, var2_r, atol=1e-5), "var mismatch (padded batch)"
    assert jnp.allclose(val2, val2_r, atol=1e-5), "value mismatch (padded batch)"

    print("KERNEL_OK")
</pallas_src>

<mosaic_0001>
module attributes {stable_mosaic.version = 11 : i64} {
  func.func @_a2c_kernel(%arg0: i32, %arg1: memref<8x16xf32, #tpu.memory_space<vmem>>, %arg2: memref<16x32xf32, #tpu.memory_space<vmem>>, %arg3: memref<1x32xf32, #tpu.memory_space<vmem>>, %arg4: memref<32x9xf32, #tpu.memory_space<vmem>>, %arg5: memref<1x9xf32, #tpu.memory_space<vmem>>, %arg6: memref<8x4xf32, #tpu.memory_space<vmem>>, %arg7: memref<8x4xf32, #tpu.memory_space<vmem>>, %arg8: memref<8x1xf32, #tpu.memory_space<vmem>>) attributes {dimension_semantics = [#tpu.dimension_semantics<parallel>], iteration_bounds = array<i64: 1>, scalar_prefetch = 0 : i64, scratch_operands = 0 : i64, tpu.core_type = #tpu.core_type<tc>, window_params = [{transform_indices = @transform_0, window_bounds = array<i64: 8, 16>}, {pipeline_mode = #tpu.pipeline_mode<synchronous>, transform_indices = @transform_1, window_bounds = array<i64: 16, 32>}, {pipeline_mode = #tpu.pipeline_mode<synchronous>, transform_indices = @transform_2, window_bounds = array<i64: 1, 32>}, {pipeline_mode = #tpu.pipeline_mode<synchronous>, transform_indices = @transform_3, window_bounds = array<i64: 32, 9>}, {pipeline_mode = #tpu.pipeline_mode<synchronous>, transform_indices = @transform_4, window_bounds = array<i64: 1, 9>}, {transform_indices = @transform_5, window_bounds = array<i64: 8, 4>}, {transform_indices = @transform_6, window_bounds = array<i64: 8, 4>}, {transform_indices = @transform_7, window_bounds = array<i64: 8, 1>}]} {
    %c0 = arith.constant 0 : index
    %c0_0 = arith.constant 0 : index
    %0 = vector.load %arg1[%c0, %c0_0] : memref<8x16xf32, #tpu.memory_space<vmem>>, vector<8x16xf32>
    %c0_1 = arith.constant 0 : index
    %c0_2 = arith.constant 0 : index
    %1 = vector.load %arg2[%c0_1, %c0_2] : memref<16x32xf32, #tpu.memory_space<vmem>>, vector<16x32xf32>
    %cst = arith.constant dense<0.000000e+00> : vector<8x32xf32>
    %2 = tpu.matmul %0, %1, %cst {dimension_numbers = #tpu.dot_dimension_numbers<[1], [0], [0], [1], [0, 0, 1, 1], [], []>} : vector<8x16xf32>, vector<16x32xf32>, vector<8x32xf32> -> vector<8x32xf32>
    %c0_3 = arith.constant 0 : index
    %c0_4 = arith.constant 0 : index
    %3 = vector.load %arg3[%c0_3, %c0_4] : memref<1x32xf32, #tpu.memory_space<vmem>>, vector<1x32xf32>
    %4 = vector.broadcast %3 : vector<1x32xf32> to vector<8x32xf32>
    %5 = arith.addf %2, %4 : vector<8x32xf32>
    %cst_5 = arith.constant 0.000000e+00 : f32
    %6 = vector.broadcast %cst_5 : f32 to vector<8x32xf32>
    %7 = arith.maximumf %5, %6 : vector<8x32xf32>
    %c0_6 = arith.constant 0 : index
    %c0_7 = arith.constant 0 : index
    %8 = vector.load %arg4[%c0_6, %c0_7] : memref<32x9xf32, #tpu.memory_space<vmem>>, vector<32x9xf32>
    %cst_8 = arith.constant dense<0.000000e+00> : vector<8x9xf32>
    %9 = tpu.matmul %7, %8, %cst_8 {dimension_numbers = #tpu.dot_dimension_numbers<[1], [0], [0], [1], [0, 0, 1, 1], [], []>} : vector<8x32xf32>, vector<32x9xf32>, vector<8x9xf32> -> vector<8x9xf32>
    %c0_9 = arith.constant 0 : index
    %c0_10 = arith.constant 0 : index
    %10 = vector.load %arg5[%c0_9, %c0_10] : memref<1x9xf32, #tpu.memory_space<vmem>>, vector<1x9xf32>
    %11 = vector.broadcast %10 : vector<1x9xf32> to vector<8x9xf32>
    %12 = arith.addf %9, %11 : vector<8x9xf32>
    %13 = vector.extract_strided_slice %12 {offsets = [0, 0], sizes = [8, 4], strides = [1, 1]} : vector<8x9xf32> to vector<8x4xf32>
    %14 = vector.extract_strided_slice %12 {offsets = [0, 4], sizes = [8, 4], strides = [1, 1]} : vector<8x9xf32> to vector<8x4xf32>
    %15 = math.tanh %13 : vector<8x4xf32>
    %c0_11 = arith.constant 0 : index
    %c0_12 = arith.constant 0 : index
    %16 = vector.load %arg6[%c0_11, %c0_12] : memref<8x4xf32, #tpu.memory_space<vmem>>, vector<8x4xf32>
    tpu.vector_store %arg6[%c0_11, %c0_12], %15 {strides = array<i32>} : memref<8x4xf32, #tpu.memory_space<vmem>>, vector<8x4xf32>,
    %cst_13 = arith.constant 0.000000e+00 : f32
    %17 = vector.broadcast %cst_13 : f32 to vector<8x4xf32>
    %18 = arith.maximumf %14, %17 : vector<8x4xf32>
    %19 = math.absf %14 : vector<8x4xf32>
    %cst_14 = arith.constant 0.000000e+00 : f32
    %20 = vector.broadcast %cst_14 : f32 to vector<8x4xf32>
    %21 = arith.subf %20, %19 : vector<8x4xf32>
    %22 = math.exp %21 : vector<8x4xf32>
    %23 = math.log1p %22 : vector<8x4xf32>
    %24 = arith.addf %18, %23 : vector<8x4xf32>
    %c0_15 = arith.constant 0 : index
    %c0_16 = arith.constant 0 : index
    %25 = vector.load %arg7[%c0_15, %c0_16] : memref<8x4xf32, #tpu.memory_space<vmem>>, vector<8x4xf32>
    tpu.vector_store %arg7[%c0_15, %c0_16], %24 {strides = array<i32>} : memref<8x4xf32, #tpu.memory_space<vmem>>, vector<8x4xf32>,
    %26 = vector.extract_strided_slice %12 {offsets = [0, 8], sizes = [8, 1], strides = [1, 1]} : vector<8x9xf32> to vector<8x1xf32>
    %c0_17 = arith.constant 0 : index
    %c0_18 = arith.constant 0 : index
    %27 = vector.load %arg8[%c0_17, %c0_18] : memref<8x1xf32, #tpu.memory_space<vmem>>, vector<8x1xf32>
    tpu.vector_store %arg8[%c0_17, %c0_18], %26 {strides = array<i32>} : memref<8x1xf32, #tpu.memory_space<vmem>>, vector<8x1xf32>,
    return
  }
  func.func @transform_0(%arg0: i32) -> (i32, i32) {
    %c0_i32 = arith.constant 0 : i32
    %c0_i32_0 = arith.constant 0 : i32
    return %arg0, %c0_i32 : i32, i32
  }
  func.func @transform_1(%arg0: i32) -> (i32, i32) {
    %c0_i32 = arith.constant 0 : i32
    %c0_i32_0 = arith.constant 0 : i32
    %c0_i32_1 = arith.constant 0 : i32
    return %c0_i32, %c0_i32_0 : i32, i32
  }
  func.func @transform_2(%arg0: i32) -> (i32, i32) {
    %c0_i32 = arith.constant 0 : i32
    %c0_i32_0 = arith.constant 0 : i32
    %c0_i32_1 = arith.constant 0 : i32
    return %c0_i32, %c0_i32_0 : i32, i32
  }
  func.func @transform_3(%arg0: i32) -> (i32, i32) {
    %c0_i32 = arith.constant 0 : i32
    %c0_i32_0 = arith.constant 0 : i32
    %c0_i32_1 = arith.constant 0 : i32
    return %c0_i32, %c0_i32_0 : i32, i32
  }
  func.func @transform_4(%arg0: i32) -> (i32, i32) {
    %c0_i32 = arith.constant 0 : i32
    %c0_i32_0 = arith.constant 0 : i32
    %c0_i32_1 = arith.constant 0 : i32
    return %c0_i32, %c0_i32_0 : i32, i32
  }
  func.func @transform_5(%arg0: i32) -> (i32, i32) {
    %c0_i32 = arith.constant 0 : i32
    %c0_i32_0 = arith.constant 0 : i32
    return %arg0, %c0_i32 : i32, i32
  }
  func.func @transform_6(%arg0: i32) -> (i32, i32) {
    %c0_i32 = arith.constant 0 : i32
    %c0_i32_0 = arith.constant 0 : i32
    return %arg0, %c0_i32 : i32, i32
  }
  func.func @transform_7(%arg0: i32) -> (i32, i32) {
    %c0_i32 = arith.constant 0 : i32
    %c0_i32_0 = arith.constant 0 : i32
    return %arg0, %c0_i32 : i32, i32
  }
}

</mosaic_0001>

<bundles_post_ra>
// kernel: tpu_custom_call.1
= control target key start
LH: loop header
LB: loop body
LE: loop exit
PB: predicated region body
PF: predicated region fallthrough
CT: control target
= control target key end

     0   :  { %vm30_vm0 = vcmask 130048   ;;  %vm63_vm1 = vcmask 261120   ;;  %vm88_vm2 = vcmask 31744   ;;  %s141_s17 = smov 120   ;;  %vm114_vm4 = vcmask 7168   ;;  %s220_s1 = inlined_call_operand.vmem [shape: f32[16,32], index: 1, kind: input, shape index: {}]   ;;  %s221_s0 = inlined_call_operand.vmem [shape: f32[8,16], index: 0, kind: input, shape index: {}]   ;;  %s222_s3 = inlined_call_operand.vmem [shape: f32[32,9], index: 3, kind: input, shape index: {}]   ;;  %s223_s2 = inlined_call_operand.vmem [shape: f32[1,32], index: 2, kind: input, shape index: {}]   ;;  %s224_s4 = inlined_call_operand.vmem [shape: f32[1,9], index: 4, kind: input, shape index: {}]   ;;  %s225_s5 = inlined_call_operand.vmem [shape: f32[8,4], index: 5, kind: output, shape index: {0}]   ;;  %s226_s6 = inlined_call_operand.vmem [shape: f32[8,4], index: 6, kind: output, shape index: {1}]   ;;  %s227_s7 = inlined_call_operand.vmem [shape: f32[8,1], index: 7, kind: output, shape index: {2}]  }
   0x1   :  { %v25_v0 = vld [vmem:[%s220_s1 + $0x8] sm:$0xff]  ;;  %v24_v1 = vld [vmem:[%s220_s1] sm:$0xff]  ;;  %v58_v3 = vld [vmem:[%s222_s3 + $0x18] sm:$0xff] }
   0x2   :  { %48 = vmatpush.msra.mxu0 %v25_v0  ;;  %v23_v2 = vld [vmem:[%s221_s0] sm:$0xff]  ;;  %79 = vmatpush.msra.mxu1 %v58_v3  ;;  %v57_v4 = vld [vmem:[%s222_s3 + $0x10] sm:$0xff]  ;;  %v56_v5 = vld [vmem:[%s222_s3 + $0x8] sm:$0xff] }
   0x3   :  { %v55_v6 = vld [vmem:[%s222_s3] sm:$0xff] }
   0x4   :  { %49 = vmatpush.msra.mxu0 %v24_v1  ;;  %80 = vmatpush.msra.mxu1 %v57_v4  ;;  %v132_v7 = vld [vmem:[%s223_s2] ss:$0 sm:$0xff] }
   0x5   :  { %128 = vmatmul.msk.f32.vlgmr.msra.gmra.mxu0 %vm30_vm0, %v23_v2  ;;  %v133_v11 = vld [vmem:[%s224_s4] ss:$0 sm:$0xff]  ;;  %s140_s4 = smov 124  }
   0x6   :  { %81 = vmatpush.msra.mxu1 %v56_v5 }
   0x8   :  { %82 = vmatpush.msra.mxu1 %v55_v6 }
  0x82   :  { %v51_v8 = vpop.f32.mrf.mxu0 }
  0x83   :  { %v52_v9 = vadd.f32 %v132_v7, %v51_v8 }
  0x85   :  { %v54_v10 = vmax.f32 %v52_v9, 0.0 }
  0x87   :  { %129 = vmatmul.msk.f32.vlgmr.msra.gmra.mxu1 %vm63_vm1, %v54_v10 }
 0x104   :  { %v84_v12 = vpop.f32.mrf.mxu1 }
 0x105   :  { %v85_v13 = vadd.f32 %v133_v11, %v84_v12 }
 0x107   :  { %134 = vtanh.f32 %v85_v13  ;;  %v91_v14 = vand.u32 2147483647, %v85_v13  ;;  %v90_v26 = vmax.f32 %v85_v13, 0.0 }
 0x109   :  { %v92_v15 = vsub.f32 0.0, %v91_v14 }
 0x10b   :  { %v93_v16 = vmul.f32 1.442695, %v92_v15 }
 0x10d   :  { %v135_v17 = vpop.eup %134  ;;  %136 = vpow2.f32 %v93_v16 }
 0x10e   :  { %89 = vst.msk [vmem:[%s225_s5] sm:$0xff] %vm88_vm2, %v135_v17 }
 0x113   :  { %v137_v18 = vpop.eup %136 }
 0x114   :  { %v95_v19 = vadd.f32 1.0, %v137_v18  ;;  %v98_v20 = vmul.f32 -0.5, %v137_v18  ;;  %v101_v22 = vand.u32 2147483647, %v137_v18 }
 0x116   :  { %138 = vlog2.f32 %v95_v19  ;;  %v99_v21 = vadd.f32 1.0, %v98_v20  ;;  %vm102_vm3 = vcmp.lt.f32.partialorder %v101_v22, 0.0004427343 }
 0x118   :  { %v100_v25 = vmul.f32 %v137_v18, %v99_v21 }
 0x11c   :  { %v139_v23 = vpop.eup %138 }
 0x11d   :  { %v97_v24 = vmul.f32 0.6931472, %v139_v23 }
 0x11f   :  { %v103_v27 = vsel %vm102_vm3, %v100_v25, %v97_v24 }
 0x120   :  { %v104_v28 = vadd.f32 %v103_v27, %v90_v26 }
 0x122   :  { %106 = vrot.lane.b32.xlu0 %v104_v28, %s140_s4 }
 0x12a   :  { %111 = vrot.lane.b32.xlu0 %v85_v13, %s141_s17 }
 0x194   :  { %v107_v29 = vpop.permute.xlu0 %106 }
 0x195   :  { %109 = vst.msk [vmem:[%s226_s6] sm:$0xff] %vm88_vm2, %v107_v29 }
 0x19c   :  { %v112_v30 = vpop.permute.xlu0 %111 }
 0x19d   :  { %115 = vst.msk [vmem:[%s227_s7] sm:$0xff] %vm114_vm4, %v112_v30 }

</bundles_post_ra>
